<compile_context>
chip_gen: v6e
topology: v6e:2x2x1
jax: 0.10.0
libtpu: 0.0.40
codegen_flags: <defaults>
</compile_context>

<pallas_src>
import jax
import jax.numpy as jnp
from jax.experimental import pallas as pl
from jax.experimental.pallas import tpu as pltpu

LN_EPS = 1e-5  # torch.nn.LayerNorm default


def ffn_kernel(x_ref, w1_ref, b1_ref, w2_ref, b2_ref, g_ref, beta_ref, o_ref, acc_ref):
    # grid = (token_tiles, hidden_chunks); hidden chunk axis is the inner
    # ("arbitrary") reduction-style axis, acc_ref persists across it.
    k = pl.program_id(1)
    x_bf = x_ref[...]                                     # (tm, d_in) bf16

    @pl.when(k == 0)
    def _():
        # Initialize with residual (f32) + output bias; accumulated exactly once.
        acc_ref[...] = x_bf.astype(jnp.float32) + b2_ref[...]

    # w_1 chunk: Conv1d(d_in, d_hid, 1) restricted to hidden slice k -> ReLU.
    h = jnp.dot(x_bf, w1_ref[...], preferred_element_type=jnp.float32) + b1_ref[...]
    h = jnp.maximum(h, 0.0)
    # w_2 chunk: partial contribution of this hidden slice to the output.
    acc_ref[...] += jnp.dot(h.astype(jnp.bfloat16), w2_ref[...],
                            preferred_element_type=jnp.float32)

    # TODO(synk): dropout is identity here (inference / eval semantics).

    @pl.when(k == pl.num_programs(1) - 1)
    def _():
        # LayerNorm over the feature axis; two lane reductions (mean, then
        # centered variance), f32 statistics.
        y = acc_ref[...]
        mean = jnp.mean(y, axis=-1, keepdims=True)
        yc = y - mean
        var = jnp.mean(yc * yc, axis=-1, keepdims=True)
        y_norm = yc * jax.lax.rsqrt(var + LN_EPS)
        o_ref[...] = (y_norm * g_ref[...] + beta_ref[...]).astype(o_ref.dtype)


def _pick_tm(M, tm):
    """MXU-friendly token tile: 128-multiple, >=2 grid steps, minimal padding."""
    if M <= 128:
        return pl.cdiv(max(M, 8), 8) * 8           # tiny problem: one small tile
    tm = max(128, (min(tm, M) // 128) * 128)
    max_tm_for_2_steps = 128 * pl.cdiv(pl.cdiv(M, 128), 2)
    return min(tm, max_tm_for_2_steps)


def _pick_tk(d_hid, tk):
    """Hidden chunk: multiple of 128 that divides d_hid (d_hid itself is 128-mult)."""
    tk = min(max(128, (tk // 128) * 128), d_hid)
    while d_hid % tk:
        tk -= 128
    return tk


def _vmem_cap_bytes():
    """Physical VMEM minus headroom for compiler scratch; generation aware."""
    try:
        phys = int(pltpu.get_tpu_info().vmem_capacity_bytes)
    except Exception:
        phys = 64 << 20                            # conservative (v7x per-core)
    return max(min(phys - (16 << 20), 100 << 20), 32 << 20)


def positionwise_feed_forward(x, w1, b1, w2, b2, gamma, beta, *, tm=512, tk=512):
    """x: (B, L, d_in); w1: (d_in, d_hid); w2: (d_hid, d_in) -> (B, L, d_in).

    For repeated calls, pre-cast w1/w2 to bfloat16 once at the call site (the cast
    here only runs if they are not already bf16).
    """
    B, L, d_in = x.shape
    d_hid = w1.shape[1]
    # Lane density: masked partial stores / narrow MXU tiles are the biggest perf
    # cliff, so require feature dims to be multiples of 128.
    assert d_in % 128 == 0 and d_hid % 128 == 0, "d_in/d_hid must be multiples of 128"

    M = B * L
    tm = _pick_tm(M, tm)
    tk = _pick_tk(d_hid, tk)
    m_pad = pl.cdiv(M, tm) * tm
    m_tiles = m_pad // tm
    k_tiles = d_hid // tk
    grid = (m_tiles, k_tiles)

    # bf16 activations on the wire: halves x's HBM traffic (memory-bound regime);
    # residual / LN statistics are recovered in f32 inside the kernel.
    x2d = x.reshape(M, d_in).astype(jnp.bfloat16)
    if m_pad != M:
        x2d = jnp.pad(x2d, ((0, m_pad - M), (0, 0)))   # remainder tile via padding

    w1_bf = w1 if w1.dtype == jnp.bfloat16 else w1.astype(jnp.bfloat16)
    w2_bf = w2 if w2.dtype == jnp.bfloat16 else w2.astype(jnp.bfloat16)
    b1_2d = b1.reshape(1, d_hid).astype(jnp.float32)
    b2_2d = b2.reshape(1, d_in).astype(jnp.float32)
    g_2d = gamma.reshape(1, d_in).astype(jnp.float32)
    be_2d = beta.reshape(1, d_in).astype(jnp.float32)

    out_dtype = x.dtype

    # VMEM budget (double-buffered pipelined operands, single-counted):
    vmem_need = (
        2 * tm * d_in * 2            # x tile (bf16, double-buffered)
        + 2 * tm * d_in * 4          # out tile (f32, double-buffered)
        + 2 * d_in * tk * 2          # W1 chunk (bf16, double-buffered)
        + 2 * tk * d_in * 2          # W2 chunk (bf16, double-buffered)
        + 2 * tk * 4 + 2 * 3 * d_in * 4   # b1 chunk + b2/gamma/beta
        + tm * d_in * 4              # f32 accumulator scratch
        + tm * tk * 4                # live hidden chunk
    )
    vmem_limit = int(min(max(vmem_need + (8 << 20), 32 << 20), _vmem_cap_bytes()))

    cost = pl.CostEstimate(
        flops=4 * m_pad * d_in * d_hid,                     # two matmuls
        transcendentals=m_pad,                              # rsqrt per token
        bytes_accessed=(m_pad * d_in * 2                    # x in (bf16)
                        + m_pad * d_in * 4                  # out (f32)
                        + m_tiles * 2 * d_in * d_hid * 2    # W1+W2 streamed per token tile
                        + (d_hid + 3 * d_in) * 4),          # bias / LN vectors
    )

    out = pl.pallas_call(
        ffn_kernel,
        out_shape=jax.ShapeDtypeStruct((m_pad, d_in), out_dtype),
        grid_spec=pltpu.PrefetchScalarGridSpec(
            num_scalar_prefetch=0,
            grid=grid,
            in_specs=[
                pl.BlockSpec((tm, d_in), lambda i, k: (i, 0)),   # x tile (k-invariant)
                pl.BlockSpec((d_in, tk), lambda i, k: (0, k)),   # W1 chunk (streamed)
                pl.BlockSpec((1, tk),    lambda i, k: (0, k)),   # b1 chunk
                pl.BlockSpec((tk, d_in), lambda i, k: (k, 0)),   # W2 chunk (streamed)
                pl.BlockSpec((1, d_in),  lambda i, k: (0, 0)),   # b2
                pl.BlockSpec((1, d_in),  lambda i, k: (0, 0)),   # gamma
                pl.BlockSpec((1, d_in),  lambda i, k: (0, 0)),   # beta
            ],
            out_specs=pl.BlockSpec((tm, d_in), lambda i, k: (i, 0)),
            scratch_shapes=[pltpu.VMEM((tm, d_in), jnp.float32)],   # y accumulator
        ),
        compiler_params=pltpu.CompilerParams(
            # token tiles shard across TCs (v7x megacore); hidden axis is the
            # accumulation axis (output block index constant across it).
            dimension_semantics=("parallel", "arbitrary"),
            vmem_limit_bytes=vmem_limit,
        ),
        cost_estimate=cost,
    )(x2d, w1_bf, b1_2d, w2_bf, b2_2d, g_2d, be_2d)

    if m_pad != M:
        out = out[:M]
    return out.reshape(B, L, d_in)


def reference(x, w1, b1, w2, b2, gamma, beta):
    # Matches the kernel's numerics: bf16 matmul operands AND bf16-rounded x for
    # the residual (x travels bf16 over HBM), f32 accumulation / statistics.
    xb = x.astype(jnp.bfloat16)
    w1b = w1.astype(jnp.bfloat16)
    w2b = w2.astype(jnp.bfloat16)
    h = jnp.einsum("bld,dh->blh", xb, w1b, preferred_element_type=jnp.float32) + b1
    h = jnp.maximum(h, 0.0)
    y = jnp.einsum("blh,hd->bld", h.astype(jnp.bfloat16), w2b,
                   preferred_element_type=jnp.float32) + b2 + xb.astype(jnp.float32)
    mean = jnp.mean(y, axis=-1, keepdims=True)
    var = jnp.mean((y - mean) ** 2, axis=-1, keepdims=True)
    return (y - mean) / jnp.sqrt(var + LN_EPS) * gamma + beta


if __name__ == "__main__":
    # Small but lane-dense shapes: d_in, d_hid multiples of 128.  B*L = 500 is not
    # tile-divisible (exercises the pad-to-tile path); tm=128 gives a 4-step token
    # grid (real pipeline / megacore sharding) and tk=128 gives 2 hidden chunks
    # (exercises the accumulate + pl.when(last) LayerNorm path).
    B, L, d_in, d_hid = 2, 250, 128, 256

    key = jax.random.PRNGKey(0)
    kx, k1, kb1, k2, kb2 = jax.random.split(key, 5)

    x = jax.random.normal(kx, (B, L, d_in), dtype=jnp.float32)
    # Conv1d(d_in, d_hid, 1) weight is (d_hid, d_in, 1); we pass its (d_in, d_hid)
    # transpose so the kernel does x @ W1 directly.
    w1 = jax.random.normal(k1, (d_in, d_hid), dtype=jnp.float32) * 0.1
    b1 = jax.random.normal(kb1, (d_hid,), dtype=jnp.float32) * 0.1
    w2 = jax.random.normal(k2, (d_hid, d_in), dtype=jnp.float32) * 0.1
    b2 = jax.random.normal(kb2, (d_in,), dtype=jnp.float32) * 0.1
    gamma = jnp.ones((d_in,), dtype=jnp.float32)    # LayerNorm weight init
    beta = jnp.zeros((d_in,), dtype=jnp.float32)    # LayerNorm bias init

    # Hoist the bf16 weight cast out of the (repeated) call path.
    w1_bf = w1.astype(jnp.bfloat16)
    w2_bf = w2.astype(jnp.bfloat16)

    out = positionwise_feed_forward(x, w1_bf, b1, w2_bf, b2, gamma, beta,
                                    tm=128, tk=128)
    out = jax.block_until_ready(out)

    ref = reference(x, w1, b1, w2, b2, gamma, beta)
    assert out.shape == (B, L, d_in)
    assert jnp.allclose(out, ref, atol=2e-3, rtol=2e-3), \
        float(jnp.max(jnp.abs(out - ref)))

    print("KERNEL_OK")
</pallas_src>

<mosaic_0001>
module attributes {stable_mosaic.version = 11 : i64} {
  func.func @ffn_kernel(%arg0: i32, %arg1: i32, %arg2: memref<128x128xbf16, #tpu.memory_space<vmem>>, %arg3: memref<128x128xbf16, #tpu.memory_space<vmem>>, %arg4: memref<1x128xf32, #tpu.memory_space<vmem>>, %arg5: memref<128x128xbf16, #tpu.memory_space<vmem>>, %arg6: memref<1x128xf32, #tpu.memory_space<vmem>>, %arg7: memref<1x128xf32, #tpu.memory_space<vmem>>, %arg8: memref<1x128xf32, #tpu.memory_space<vmem>>, %arg9: memref<128x128xf32, #tpu.memory_space<vmem>>, %arg10: memref<128x128xf32, #tpu.memory_space<vmem>>) attributes {dimension_semantics = [#tpu.dimension_semantics<parallel>, #tpu.dimension_semantics<arbitrary>], iteration_bounds = array<i64: 4, 2>, scalar_prefetch = 0 : i64, scratch_operands = 1 : i64, tpu.core_type = #tpu.core_type<tc>, window_params = [{transform_indices = @transform_0, window_bounds = array<i64: 128, 128>}, {transform_indices = @transform_1, window_bounds = array<i64: 128, 128>}, {transform_indices = @transform_2, window_bounds = array<i64: 1, 128>}, {transform_indices = @transform_3, window_bounds = array<i64: 128, 128>}, {pipeline_mode = #tpu.pipeline_mode<synchronous>, transform_indices = @transform_4, window_bounds = array<i64: 1, 128>}, {pipeline_mode = #tpu.pipeline_mode<synchronous>, transform_indices = @transform_5, window_bounds = array<i64: 1, 128>}, {pipeline_mode = #tpu.pipeline_mode<synchronous>, transform_indices = @transform_6, window_bounds = array<i64: 1, 128>}, {transform_indices = @transform_7, window_bounds = array<i64: 128, 128>}]} {
    %c0 = arith.constant 0 : index
    %c0_0 = arith.constant 0 : index
    %0 = vector.load %arg2[%c0, %c0_0] : memref<128x128xbf16, #tpu.memory_space<vmem>>, vector<128x128xbf16>
    %c0_i32 = arith.constant 0 : i32
    %1 = arith.cmpi eq, %arg1, %c0_i32 : i32
    %2 = arith.extui %1 : i1 to i32
    %c0_i32_1 = arith.constant 0 : i32
    %3 = arith.cmpi ne, %2, %c0_i32_1 : i32
    scf.if %3 {
      %20 = arith.extf %0 : vector<128x128xbf16> to vector<128x128xf32>
      %c0_15 = arith.constant 0 : index
      %c0_16 = arith.constant 0 : index
      %21 = vector.load %arg6[%c0_15, %c0_16] : memref<1x128xf32, #tpu.memory_space<vmem>>, vector<1x128xf32>
      %22 = vector.broadcast %21 : vector<1x128xf32> to vector<128x128xf32>
      %23 = arith.addf %20, %22 : vector<128x128xf32>
      %c0_17 = arith.constant 0 : index
      %c0_18 = arith.constant 0 : index
      %24 = vector.load %arg10[%c0_17, %c0_18] : memref<128x128xf32, #tpu.memory_space<vmem>>, vector<128x128xf32>
      tpu.vector_store %arg10[%c0_17, %c0_18], %23 {strides = array<i32>} : memref<128x128xf32, #tpu.memory_space<vmem>>, vector<128x128xf32>,
    } else {
    }
    %c0_2 = arith.constant 0 : index
    %c0_3 = arith.constant 0 : index
    %4 = vector.load %arg3[%c0_2, %c0_3] : memref<128x128xbf16, #tpu.memory_space<vmem>>, vector<128x128xbf16>
    %cst = arith.constant dense<0.000000e+00> : vector<128x128xf32>
    %5 = tpu.matmul %0, %4, %cst {dimension_numbers = #tpu.dot_dimension_numbers<[1], [0], [0], [1], [0, 0, 1, 1], [], []>} : vector<128x128xbf16>, vector<128x128xbf16>, vector<128x128xf32> -> vector<128x128xf32>
    %c0_4 = arith.constant 0 : index
    %c0_5 = arith.constant 0 : index
    %6 = vector.load %arg4[%c0_4, %c0_5] : memref<1x128xf32, #tpu.memory_space<vmem>>, vector<1x128xf32>
    %7 = vector.broadcast %6 : vector<1x128xf32> to vector<128x128xf32>
    %8 = arith.addf %5, %7 : vector<128x128xf32>
    %cst_6 = arith.constant 0.000000e+00 : f32
    %9 = vector.broadcast %cst_6 : f32 to vector<128x128xf32>
    %10 = arith.maximumf %8, %9 : vector<128x128xf32>
    %c0_7 = arith.constant 0 : index
    %c0_8 = arith.constant 0 : index
    %11 = vector.load %arg10[%c0_7, %c0_8] : memref<128x128xf32, #tpu.memory_space<vmem>>, vector<128x128xf32>
    %12 = arith.truncf %10 : vector<128x128xf32> to vector<128x128xbf16>
    %c0_9 = arith.constant 0 : index
    %c0_10 = arith.constant 0 : index
    %13 = vector.load %arg5[%c0_9, %c0_10] : memref<128x128xbf16, #tpu.memory_space<vmem>>, vector<128x128xbf16>
    %cst_11 = arith.constant dense<0.000000e+00> : vector<128x128xf32>
    %14 = tpu.matmul %12, %13, %cst_11 {dimension_numbers = #tpu.dot_dimension_numbers<[1], [0], [0], [1], [0, 0, 1, 1], [], []>} : vector<128x128xbf16>, vector<128x128xbf16>, vector<128x128xf32> -> vector<128x128xf32>
    %15 = arith.addf %11, %14 : vector<128x128xf32>
    %c0_12 = arith.constant 0 : index
    %c0_13 = arith.constant 0 : index
    %16 = vector.load %arg10[%c0_12, %c0_13] : memref<128x128xf32, #tpu.memory_space<vmem>>, vector<128x128xf32>
    tpu.vector_store %arg10[%c0_12, %c0_13], %15 {strides = array<i32>} : memref<128x128xf32, #tpu.memory_space<vmem>>, vector<128x128xf32>,
    %c1_i32 = arith.constant 1 : i32
    %17 = arith.cmpi eq, %arg1, %c1_i32 : i32
    %18 = arith.extui %17 : i1 to i32
    %c0_i32_14 = arith.constant 0 : i32
    %19 = arith.cmpi ne, %18, %c0_i32_14 : i32
    scf.if %19 {
      %c0_15 = arith.constant 0 : index
      %c0_16 = arith.constant 0 : index
      %20 = vector.load %arg10[%c0_15, %c0_16] : memref<128x128xf32, #tpu.memory_space<vmem>>, vector<128x128xf32>
      %cst_17 = arith.constant dense<0.000000e+00> : vector<128xf32>
      %21 = vector.multi_reduction <add>, %20, %cst_17 [1] : vector<128x128xf32> to vector<128xf32>
      %22 = vector.shape_cast %21 : vector<128xf32> to vector<128x1xf32>
      %cst_18 = arith.constant 1.280000e+02 : f32
      %23 = vector.broadcast %cst_18 : f32 to vector<128x1xf32>
      %24 = arith.divf %22, %23 : vector<128x1xf32>
      %25 = vector.broadcast %24 : vector<128x1xf32> to vector<128x128xf32>
      %26 = arith.subf %20, %25 : vector<128x128xf32>
      %27 = arith.mulf %26, %26 : vector<128x128xf32>
      %cst_19 = arith.constant dense<0.000000e+00> : vector<128xf32>
      %28 = vector.multi_reduction <add>, %27, %cst_19 [1] : vector<128x128xf32> to vector<128xf32>
      %29 = vector.shape_cast %28 : vector<128xf32> to vector<128x1xf32>
      %cst_20 = arith.constant 1.280000e+02 : f32
      %30 = vector.broadcast %cst_20 : f32 to vector<128x1xf32>
      %31 = arith.divf %29, %30 : vector<128x1xf32>
      %cst_21 = arith.constant 9.99999974E-6 : f32
      %32 = vector.broadcast %cst_21 : f32 to vector<128x1xf32>
      %33 = arith.addf %31, %32 : vector<128x1xf32>
      %34 = math.rsqrt %33 : vector<128x1xf32>
      %35 = vector.broadcast %34 : vector<128x1xf32> to vector<128x128xf32>
      %36 = arith.mulf %26, %35 : vector<128x128xf32>
      %c0_22 = arith.constant 0 : index
      %c0_23 = arith.constant 0 : index
      %37 = vector.load %arg7[%c0_22, %c0_23] : memref<1x128xf32, #tpu.memory_space<vmem>>, vector<1x128xf32>
      %38 = vector.broadcast %37 : vector<1x128xf32> to vector<128x128xf32>
      %39 = arith.mulf %36, %38 : vector<128x128xf32>
      %c0_24 = arith.constant 0 : index
      %c0_25 = arith.constant 0 : index
      %40 = vector.load %arg8[%c0_24, %c0_25] : memref<1x128xf32, #tpu.memory_space<vmem>>, vector<1x128xf32>
      %41 = vector.broadcast %40 : vector<1x128xf32> to vector<128x128xf32>
      %42 = arith.addf %39, %41 : vector<128x128xf32>
      %c0_26 = arith.constant 0 : index
      %c0_27 = arith.constant 0 : index
      %43 = vector.load %arg9[%c0_26, %c0_27] : memref<128x128xf32, #tpu.memory_space<vmem>>, vector<128x128xf32>
      tpu.vector_store %arg9[%c0_26, %c0_27], %42 {strides = array<i32>} : memref<128x128xf32, #tpu.memory_space<vmem>>, vector<128x128xf32>,
    } else {
    }
    return
  }
  func.func @transform_0(%arg0: i32, %arg1: i32) -> (i32, i32) {
    %c0_i32 = arith.constant 0 : i32
    %c0_i32_0 = arith.constant 0 : i32
    return %arg0, %c0_i32 : i32, i32
  }
  func.func @transform_1(%arg0: i32, %arg1: i32) -> (i32, i32) {
    %c0_i32 = arith.constant 0 : i32
    %c0_i32_0 = arith.constant 0 : i32
    return %c0_i32, %arg1 : i32, i32
  }
  func.func @transform_2(%arg0: i32, %arg1: i32) -> (i32, i32) {
    %c0_i32 = arith.constant 0 : i32
    %c0_i32_0 = arith.constant 0 : i32
    return %c0_i32, %arg1 : i32, i32
  }
  func.func @transform_3(%arg0: i32, %arg1: i32) -> (i32, i32) {
    %c0_i32 = arith.constant 0 : i32
    %c0_i32_0 = arith.constant 0 : i32
    return %arg1, %c0_i32 : i32, i32
  }
  func.func @transform_4(%arg0: i32, %arg1: i32) -> (i32, i32) {
    %c0_i32 = arith.constant 0 : i32
    %c0_i32_0 = arith.constant 0 : i32
    %c0_i32_1 = arith.constant 0 : i32
    return %c0_i32, %c0_i32_0 : i32, i32
  }
  func.func @transform_5(%arg0: i32, %arg1: i32) -> (i32, i32) {
    %c0_i32 = arith.constant 0 : i32
    %c0_i32_0 = arith.constant 0 : i32
    %c0_i32_1 = arith.constant 0 : i32
    return %c0_i32, %c0_i32_0 : i32, i32
  }
  func.func @transform_6(%arg0: i32, %arg1: i32) -> (i32, i32) {
    %c0_i32 = arith.constant 0 : i32
    %c0_i32_0 = arith.constant 0 : i32
    %c0_i32_1 = arith.constant 0 : i32
    return %c0_i32, %c0_i32_0 : i32, i32
  }
  func.func @transform_7(%arg0: i32, %arg1: i32) -> (i32, i32) {
    %c0_i32 = arith.constant 0 : i32
    %c0_i32_0 = arith.constant 0 : i32
    return %arg0, %c0_i32 : i32, i32
  }
}

</mosaic_0001>

<bundles_post_ra>
// kernel: tpu_custom_call.1
= control target key start
LH: loop header
LB: loop body
LE: loop exit
PB: predicated region body
PF: predicated region fallthrough
CT: control target
= control target key end

     0   :  { %s2460_s0 = inlined_call_operand.hbm [shape: bf16[512,128], index: 0, kind: input, shape index: {}]   ;;  %s2461_s1 = inlined_call_operand.hbm [shape: bf16[128,256], index: 1, kind: input, shape index: {}]   ;;  %s2462_s2 = inlined_call_operand.vmem [shape: f32[1,256], index: 2, kind: input, shape index: {}]   ;;  %s2463_s3 = inlined_call_operand.hbm [shape: bf16[256,128], index: 3, kind: input, shape index: {}]   ;;  %s2464_s4 = inlined_call_operand.vmem [shape: f32[1,128], index: 4, kind: input, shape index: {}]   ;;  %s2465_s5 = inlined_call_operand.vmem [shape: f32[1,128], index: 5, kind: input, shape index: {}]   ;;  %s2466_s6 = inlined_call_operand.vmem [shape: f32[1,128], index: 6, kind: input, shape index: {}]   ;;  %s2467_s7 = inlined_call_operand.hbm [shape: f32[512,128], index: 7, kind: output, shape index: {}]  }
   0x1   :  { %2482 = sst [smem:[#allocation22_spill]] %s2460_s0 }
   0x2   :  { %2483 = sst [smem:[#allocation23_spill]] %s2461_s1 }
   0x3   :  { %2484 = sst [smem:[#allocation24_spill]] %s2464_s4 }
   0x4   :  { %2485 = sst [smem:[#allocation25_spill]] %s2465_s5 }
   0x5   :  { %2486 = sst [smem:[#allocation26_spill]] %s2466_s6 }
   0x6   :  { %2487 = sst [smem:[#allocation27_spill]] %s2467_s7 }
   0x7   :  { %12 = vsyncpa [#allocation4], 0 }
   0x8   :  { %14 = vsyncpa [#allocation4 + $0x1], 0 }
   0x9   :  { %15 = vsyncpa [#allocation7], 0 }
   0xa   :  { %17 = vsyncpa [#allocation7 + $0x1], 0 }
   0xb   :  { %18 = vsyncpa [#allocation5], 0 }
   0xc   :  { %20 = vsyncpa [#allocation5 + $0x1], 0  ;;  %s1911_s24 = smov 0   ;;  %s1913_s25 = smov 0  }
   0xd   :  { %s1915_s26 = smov 0   ;;  %s1917_s27 = smov 0  }
   0xe   :  { %s1919_s28 = smov 0   ;;  %s1921_s29 = smov 0  }
   0xf   :  { %s1923_s30 = smov 0   ;;  %s1925_s8 = smov 0  }
  0x10   :  { %s1927_s9 = smov 0   ;;  %s1929_s10 = smov 0  }
  0x11   :  { %s1931_s11 = smov 0  }
  0x12 LB: > { %2488 = sst [smem:[#allocation13_spill]] %s1828_s26  ;;  %s35_s12 = sadd.s32 1, %s1852_s9  ;;  %s1860_s11 = sphi %s1931_s11, %s26_s11   ;;  %s1856_s10 = sphi %s1929_s10, %s2525_s10   ;;  %s1852_s9 = sphi %s1927_s9, %s2531_s9   ;;  %s1848_s8 = sphi %s1925_s8, %s2523_s8   ;;  %s1844_s30 = sphi %s1923_s30, %s2530_s30   ;;  %s1840_s29 = sphi %s1921_s29, %s2522_s29   ;;  %s1836_s28 = sphi %s1919_s28, %s2529_s28   ;;  %s1832_s27 = sphi %s1917_s27, %s2528_s27   ;;  %s1828_s26 = sphi %s1915_s26, %s2520_s26   ;;  %s1824_s25 = sphi %s1913_s25, %s2527_s25   ;;  %s1820_s24 = sphi %s1911_s24, %s2526_s24  }
  0x13   : > { %2489 = sst [smem:[#allocation14_spill]] %s1840_s29  ;;  %p53_p0 = scmp.eq.s32.totalorder %s1860_s11, 0 }
  0x14   : > { %2490 = sst [smem:[#allocation15_spill]] %s1848_s8  ;;  %p1968_p1 = scmp.ge.s32.totalorder %s35_s12, 2 }
  0x15   : > { %2491 = sst [smem:[#allocation16_spill]] %s1856_s10  ;;  %s71_s14 = sadd.s32 1, %s1828_s26 }
  0x16   : > { %p78_p2 = scmp.ne.s32.totalorder %s1828_s26, %s1824_s25  ;;  %p84_p3 = scmp.ne.s32.totalorder %s1824_s25, %s1820_s24 }
  0x17   : > { %s2533_s12 = smov (%p1968_p1, %s35_s12), 0  ;;  %p2472_p5 = scmp.lt.s32.totalorder %s1860_s11, 8 }
  0x18   : > { %2493 = sst [smem:[#allocation17_spill]] %s2533_s12  ;;  %p80_p4 = por %p78_p2, %p53_p0 }
  0x19   : > { %s68_s15 = ssub.s32 %s1852_s9, %s2533_s12  ;;  %s279_s16 = sand.u32 1, %s1860_s11  }
  0x1a   : > { %p69_p6 = scmp.eq.s32.totalorder %s68_s15, 0  ;;  %s281_s18 = sand.u32 1, %s1828_s26  }
  0x1b   : > { %s1991_s19 = sshll.u32 %s281_s18, 6  ;;  %s1344_s20 = sshll.u32 %s1852_s9, 6 }
  0x1c   : > { %s1988_s17 = scalar_select %p69_p6, %s1828_s26, %s71_s14  }
  0x1d   : > { %s2495_s1 = sld [smem:[#allocation23_spill]]  ;;  %s283_s7 = scalar_lea.vmem [#allocation6], %s1991_s19 }
  0x1e   : > { %2494 = sst [smem:[#allocation18_spill]] %s1988_s17  ;;  %s289_s8 = sshll.u32 %s283_s7, 4  ;;  %s290_s8 = int_to_ptr.vmem [resolvable:$true] %s289_s8 }
  0x1f   : > { %p2000_p7 = pnand %p2472_p5, %p80_p4  ;;  %p1348_p8 = scmp.ge.s32.totalorder %s1860_s11, 1 }
  0x20   : > { %s2005_s14 = scalar_lea.sflag [#allocation7], %s279_s16  ;;  %s1665_s15 = scalar_lea.vmem %s290_s8, 1024 }
  0x21   : > { %p2471_p9 = pneg %p2000_p7  ;;  %p1666_p10 = scmp.ne.s32.totalorder %s290_s8, %s1665_s15 }
  0x22   : > { %s1862_s7 = smov [#allocation6]  }
  0x23   : > { %s288_s23 = scalar_lea.hbm %s2495_s1, %s1344_s20  ;;  %p1668_p11 = pnand %p1666_p10, %p2471_p9 }
  0x24   : > { %s1670_s18 = sshll.u32 %s1862_s7, 4  ;;  %s1671_s18 = int_to_ptr.vmem [resolvable:$false] %s1670_s18 }
  0x25   : > { %p1669_p12 = pneg %p1668_p11  ;;  %s1672_s20 = scalar_lea.vmem %s1671_s18, 2048 }
  0x26   : > { %p1673_p13 = scmp.lt.s32.totalorder %s290_s8, %s1671_s18  ;;  %p1674_p2 = scmp.lt.s32.totalorder %s1672_s20, %s1665_s15 }
  0x28   : > { %p1675_p4 = por %p1674_p2, %p1673_p13 }
  0x2a   : > { %p1676_p6 = pnand %p1675_p4, %p1669_p12 }
  0x2c   : > { %1679 = shalt.err (!%p1676_p6)
}
  0x2d   : > { %s1863_s21 = smov 128   ;;  %s2469_s16 = smov 64  }
  0x2e   : > { %s2473_s22 = smov 4   ;;  %p324_p10 = scmp.lt.s32.totalorder %s1860_s11, 9 }
  0x2f   : > { %1501 = dma.hbm_to_vmem [thread:$0]  (!%p2000_p7), %s288_s23, 1024, %s290_s8, %s2005_s14, %s1863_s21, %s2469_s16, %s2473_s22  }
  0x30   : > { %p2020_p11 = pnand %p1348_p8, %p324_p10  ;;  %s2025_s7 = sadd.s32 4294967295, %s1860_s11  }
  0x31   : > { %s1337_s18 = sadd.s32 4294967294, %s1860_s11   ;;  %s38_s20 = sadd.s32 1, %s1856_s10 }
  0x32   : > { %s45_s1 = sadd.s32 1, %s1840_s29  ;;  %s2535_s20 = smov (!%p1968_p1, %s38_s20), %s1856_s10 }
  0x33   : > { %p52_p12 = scmp.ne.s32.totalorder %s1840_s29, %s1836_s28  ;;  %p58_p13 = scmp.ne.s32.totalorder %s1836_s28, %s1832_s27 }
  0x34   : > { %p40_p8 = scmp.ge.s32.totalorder %s2535_s20, 4  ;;  %p59_p2 = scmp.eq.s32.totalorder %s2025_s7, 0 }
  0x35   : > { %p2040_p4 = por %p53_p0, %p52_p12  ;;  %p223_p6 = scmp.eq.s32.totalorder %s2025_s7, 7 }
  0x36   : > { %s2537_s20 = smov (%p40_p8, %s2535_s20), 0  ;;  %p2050_p1 = por %p59_p2, %p58_p13 }
  0x37   : > { %2499 = sst [smem:[#allocation19_spill]] %s2537_s20  ;;  %p2057_p10 = por %p84_p3, %p59_p2 }
  0x38   : > { %s42_s21 = ssub.s32 %s1856_s10, %s2537_s20  ;;  %p2063_p0 = por %p223_p6, %p52_p12 }
  0x39   : > { %p43_p9 = scmp.eq.s32.totalorder %s42_s21, 0  ;;  %p229_p5 = scmp.eq.s32.totalorder %s1337_s18, 7 }
  0x3a   : > { %s2502_s16 = scalar_select %p2063_p0, 1, 0 }
  0x3b   : > { %s258_s22 = sand.u32 1, %s1840_s29   ;;  %s1388_s12 = sshll.u32 %s1856_s10, 10 }
  0x3c   : > { %2503 = sst [smem:[#allocation20_spill]] %s2502_s16  ;;  %p2075_p8 = por %p229_p5, %p58_p13 }
  0x3d   : > { %s2070_s17 = scalar_select %p43_p9, %s1840_s29, %s45_s1  }
  0x3e   : > { %s2505_s26 = scalar_select %p2075_p8, 1, 0 }
  0x3f   : > { %2504 = sst [smem:[#allocation21_spill]] %s2070_s17  ;;  %s1340_s24 = sshll.u32 %s258_s22, 6 }
  0x40   : > { %s2506_s0 = sld [smem:[#allocation22_spill]]  ;;  %p2507_p3 = scmp.lt.s32.totalorder %s1860_s11, 8 }
  0x41   : > { %s262_s18 = scalar_lea.vmem [#allocation3], %s1340_s24  ;;  %s259_s21 = scalar_lea.sflag [#allocation4], %s258_s22 }
  0x42   : > { %p2086_p12 = pnand %p2507_p3, %p2040_p4  ;;  %s269_s1 = sshll.u32 %s262_s18, 4  ;;  %s270_s1 = int_to_ptr.vmem [resolvable:$true] %s269_s1 }
  0x43   : > { %s1693_s10 = scalar_lea.vmem %s270_s1, 1024  ;;  %s1866_s17 = smov [#allocation3]  }
  0x44   : > { %p1682_p5 = pneg %p2086_p12  ;;  %p1694_p9 = scmp.ne.s32.totalorder %s270_s1, %s1693_s10 }
  0x45   : > { %s1698_s4 = sshll.u32 %s1866_s17, 4  ;;  %s1699_s4 = int_to_ptr.vmem [resolvable:$false] %s1698_s4 }
  0x46   : > { %s268_s20 = scalar_lea.hbm %s2506_s0, %s1388_s12  ;;  %p1696_p13 = pnand %p1694_p9, %p1682_p5 }
  0x47   : > { %s1700_s5 = scalar_lea.vmem %s1699_s4, 2048  ;;  %p1701_p6 = scmp.lt.s32.totalorder %s270_s1, %s1699_s4 }
  0x48   : > { %p1697_p2 = pneg %p1696_p13  ;;  %p1702_p4 = scmp.lt.s32.totalorder %s1700_s5, %s1693_s10 }
  0x4a   : > { %p1703_p3 = por %p1702_p4, %p1701_p6 }
  0x4c   : > { %p1704_p8 = pnand %p1703_p3, %p1697_p2 }
  0x4e   : > { %1707 = shalt.err (!%p1704_p8)
}
  0x4f   : > { %s2509_s12 = smov 4   ;;  %s2510_s8 = smov 64  }
  0x50   : > { %1498 = dma.hbm_to_vmem [thread:$0]  (!%p2086_p12), %s268_s20, 1024, %s270_s1, %s259_s21, %s2510_s8, %s2510_s8, %s2509_s12  }
  0x51   : > { %s1389_s22 = sshll.u32 %s1852_s9, 10  ;;  %s309_s24 = scalar_lea.vmem [#allocation8], %s1991_s19 }
  0x52   : > { %s316_s18 = sshll.u32 %s309_s24, 4  ;;  %s315_s4 = scalar_lea.hbm %s2463_s3, %s1389_s22  ;;  %s317_s18 = int_to_ptr.vmem [resolvable:$true] %s316_s18 }
  0x53   : > { %s1721_s10 = scalar_lea.vmem %s317_s18, 1024  ;;  %p2511_p8 = pneg %p2000_p7 }
  0x54   : > { %p1722_p5 = scmp.ne.s32.totalorder %s317_s18, %s1721_s10  ;;  %s1867_s16 = smov [#allocation8]  }
  0x55   : > { %s1726_s5 = sshll.u32 %s1867_s16, 4  ;;  %s1727_s5 = int_to_ptr.vmem [resolvable:$false] %s1726_s5 }
  0x56   : > { %p1724_p9 = pnand %p1722_p5, %p2511_p8  ;;  %s1728_s29 = scalar_lea.vmem %s1727_s5, 2048 }
  0x57   : > { %p1729_p2 = scmp.lt.s32.totalorder %s317_s18, %s1727_s5  ;;  %p1730_p12 = scmp.lt.s32.totalorder %s1728_s29, %s1721_s10 }
  0x58   : > { %p1725_p13 = pneg %p1724_p9 }
  0x59   : > { %p1731_p6 = por %p1730_p12, %p1729_p2 }
  0x5b   : > { %p1732_p4 = pnand %p1731_p6, %p1725_p13 }
  0x5d   : > { %1735 = shalt.err (!%p1732_p4)
}
  0x5e   : > { %1504 = dma.hbm_to_vmem [thread:$0]  (!%p2000_p7), %s315_s4, 1024, %s317_s18, %s2005_s14, %s2510_s8, %s2510_s8, %s2509_s12  }
  0x5f   : > { %328 = sbr.rel (%p2020_p11) target bundleno = 961 (0x3c1), region = 48  ;;  %s2114_s0 = sand.u32 (!%p2020_p11), 1, %s1836_s28  }
  0x60   : > { %s1349_s29 = sshll.u32 (!%p2020_p11), %s2114_s0, 6  ;;  %s331_s19 = scalar_lea.sflag (!%p2020_p11), [#allocation4], %s2114_s0 }
  0x61   : > { %s334_s20 = scalar_lea.vmem (!%p2020_p11), [#allocation3], %s1349_s29 }
  0x64   : > { %1807 = dma.done.wait (%p2050_p1), %s331_s19, 1024  }
  0x65   : > { %1809 = vsyncadd (%p2050_p1), %s331_s19, 4294966272  ;;  %s339_s6 = sand.u32 1, %s2025_s7   ;;  %s341_s14 = sand.u32 1, %s1824_s25  }
  0x66   : > { %s1350_s15 = sshll.u32 %s341_s14, 6  ;;  %s340_s1 = scalar_lea.sflag [#allocation7], %s339_s6 }
  0x67   : > { %s2124_s21 = scalar_lea.vmem [#allocation6], %s1350_s15 }
  0x68   : > { %1811 = dma.done.wait (%p2057_p10), %s340_s1, 2048  }
  0x69   : > { %1813 = vsyncadd (%p2057_p10), %s340_s1, 4294965248  ;;  %s1352_s12 = sshll.u32 %s2114_s0, 7  ;;  %p397_p7 = scmp.lt.s32.totalorder %s1844_s30, 1  ;;  %v2139_v0 = vld [vmem:[%s334_s20] sm:$0xf] }
  0x6a   : > { %v2141_v1 = vld [vmem:[%s334_s20 + $0x4] sm:$0xf]  ;;  %v2143_v2 = vld [vmem:[%s334_s20 + $0x8] sm:$0xf]  ;;  %v2145_v3 = vld [vmem:[%s334_s20 + $0xc] sm:$0xf] }
  0x6b   : > { %s2133_s13 = scalar_select %p397_p7, %s1844_s30, 1  ;;  %v2147_v4 = vld [vmem:[%s334_s20 + $0x10] sm:$0xf]  ;;  %v2149_v5 = vld [vmem:[%s334_s20 + $0x14] sm:$0xf] }
  0x6c   : > { %v2151_v6 = vld [vmem:[%s334_s20 + $0x18] sm:$0xf]  ;;  %v2153_v7 = vld [vmem:[%s334_s20 + $0x1c] sm:$0xf]  ;;  %v2155_v8 = vld [vmem:[%s334_s20 + $0x20] sm:$0xf] }
  0x6d   : > { %s399_s22 = scalar_lea.vmem %s2462_s2, %s2133_s13  ;;  %v2157_v9 = vld [vmem:[%s334_s20 + $0x24] sm:$0xf]  ;;  %v2159_v10 = vld [vmem:[%s334_s20 + $0x28] sm:$0xf]  ;;  %v2161_v11 = vld [vmem:[%s334_s20 + $0x2c] sm:$0xf] }
  0x6e   : > { %v2163_v12 = vld [vmem:[%s334_s20 + $0x30] sm:$0xf]  ;;  %v2165_v13 = vld [vmem:[%s334_s20 + $0x34] sm:$0xf]  ;;  %v2167_v14 = vld [vmem:[%s334_s20 + $0x38] sm:$0xf] }
  0x6f   : > { %v2169_v15 = vld [vmem:[%s334_s20 + $0x3c] sm:$0xf]  ;;  %s2171_s23 = scalar_lea.vmem [#allocation8], %s1350_s15  ;;  %s2173_s24 = scalar_lea.vmem [#allocation9], %s1352_s12 }
  0x70   : > { %p1353_p11 = scmp.ne.s32.totalorder %s1844_s30, 0 }
  0x71   : > { %s2512_s4 = sld [smem:[#allocation24_spill]] (!%p1353_p11) }
  0x72   : > { %422 = sbr.rel (%p1353_p11) target bundleno = 131 (0x83), region = 64 }
  0x77   : > { %v423_v16 = vunpack.c.l.bf16 %v2139_v0  ;;  %v1354_v17 = vld [vmem:[%s2512_s4] ss:$0 sm:$0xff]  ;;  %v424_v18 = vunpack.c.l.bf16 %v2141_v1  ;;  %v425_v19 = vunpack.c.l.bf16 %v2143_v2  ;;  %v426_v20 = vunpack.c.l.bf16 %v2145_v3 }
  0x78   : > { %v427_v21 = vunpack.c.l.bf16 %v2147_v4  ;;  %v428_v22 = vunpack.c.l.bf16 %v2149_v5  ;;  %v429_v23 = vunpack.c.l.bf16 %v2151_v6  ;;  %v430_v24 = vunpack.c.l.bf16 %v2153_v7 }
  0x79   : > { %v446_v25 = vadd.f32 %v1354_v17, %v423_v16  ;;  %v447_v26 = vadd.f32 %v1354_v17, %v424_v18  ;;  %v448_v27 = vadd.f32 %v1354_v17, %v425_v19  ;;  %v449_v28 = vadd.f32 %v1354_v17, %v426_v20 }
  0x7a   : > { %v450_v29 = vadd.f32 %v1354_v17, %v427_v21  ;;  %v451_v30 = vadd.f32 %v1354_v17, %v428_v22  ;;  %v452_v31 = vadd.f32 %v1354_v17, %v429_v23  ;;  %v453_v32 = vadd.f32 %v1354_v17, %v430_v24 }
  0x7b   : > { %462 = vst [vmem:[#allocation2 + $0x30] sm:$0xff] %v446_v25  ;;  %463 = vst [vmem:[#allocation2] sm:$0xff] %v447_v26  ;;  %v431_v33 = vunpack.c.l.bf16 %v2155_v8  ;;  %v432_v34 = vunpack.c.l.bf16 %v2157_v9  ;;  %v433_v35 = vunpack.c.l.bf16 %v2159_v10  ;;  %v434_v36 = vunpack.c.l.bf16 %v2161_v11 }
  0x7c   : > { %464 = vst [vmem:[#allocation2 + $0x58] sm:$0xff] %v448_v27  ;;  %465 = vst [vmem:[#allocation2 + $0x18] sm:$0xff] %v449_v28  ;;  %v435_v37 = vunpack.c.l.bf16 %v2163_v12  ;;  %v436_v38 = vunpack.c.l.bf16 %v2165_v13  ;;  %v437_v39 = vunpack.c.l.bf16 %v2167_v14  ;;  %v438_v40 = vunpack.c.l.bf16 %v2169_v15 }
  0x7d   : > { %466 = vst [vmem:[#allocation2 + $0x50] sm:$0xff] %v450_v29  ;;  %467 = vst [vmem:[#allocation2 + $0x68] sm:$0xff] %v451_v30  ;;  %v454_v41 = vadd.f32 %v1354_v17, %v431_v33  ;;  %v455_v42 = vadd.f32 %v1354_v17, %v432_v34  ;;  %v456_v43 = vadd.f32 %v1354_v17, %v433_v35 }
  0x7e   : > { %468 = vst [vmem:[#allocation2 + $0x8] sm:$0xff] %v452_v31  ;;  %469 = vst [vmem:[#allocation2 + $0x48] sm:$0xff] %v453_v32  ;;  %v457_v44 = vadd.f32 %v1354_v17, %v434_v36  ;;  %v458_v45 = vadd.f32 %v1354_v17, %v435_v37  ;;  %v459_v46 = vadd.f32 %v1354_v17, %v436_v38 }
  0x7f   : > { %v460_v47 = vadd.f32 %v1354_v17, %v437_v39  ;;  %v461_v48 = vadd.f32 %v1354_v17, %v438_v40  ;;  %470 = vst [vmem:[#allocation2 + $0x40] sm:$0xff] %v454_v41  ;;  %471 = vst [vmem:[#allocation2 + $0x20] sm:$0xff] %v455_v42 }
  0x80   : > { %472 = vst [vmem:[#allocation2 + $0x10] sm:$0xff] %v456_v43  ;;  %473 = vst [vmem:[#allocation2 + $0x38] sm:$0xff] %v457_v44 }
  0x81   : > { %474 = vst [vmem:[#allocation2 + $0x60] sm:$0xff] %v458_v45  ;;  %475 = vst [vmem:[#allocation2 + $0x70] sm:$0xff] %v459_v46 }
  0x82   : > { %476 = vst [vmem:[#allocation2 + $0x78] sm:$0xff] %v460_v47  ;;  %477 = vst [vmem:[#allocation2 + $0x28] sm:$0xff] %v461_v48 }
  0x83 PF: > { %v1604_v49 = vld [vmem:[%s2124_s21 + $0x38] sm:$0xff]   ;;  %v1356_v50 = vcombine.low %v2139_v0, %v2141_v1  ;;  %v1605_v51 = vld [vmem:[%s2124_s21 + $0x30] sm:$0xff]   ;;  %v1606_v52 = vld [vmem:[%s2124_s21 + $0x28] sm:$0xff]   ;;  %v1357_v63 = vcombine.low %v2143_v2, %v2145_v3  ;;  %v1358_v0 = vcombine.low %v2147_v4, %v2149_v5  ;;  %v1359_v1 = vcombine.low %v2151_v6, %v2153_v7  ;;  %p1380_p1 = scmp.ne.s32.totalorder %s1844_s30, 1 }
  0x84   : > { %1423 = vmatprep.subr.bf16.mxu0 %v1604_v49  ;;  %v1607_v53 = vld [vmem:[%s2124_s21 + $0x20] sm:$0xff]   ;;  %v1612_v54 = vld [vmem:[%s2171_s23 + $0x38] sm:$0xff]   ;;  %v1613_v55 = vld [vmem:[%s2171_s23 + $0x30] sm:$0xff]   ;;  %v1360_v16 = vcombine.low %v2155_v8, %v2157_v9  ;;  %v1361_v17 = vcombine.low %v2159_v10, %v2161_v11  ;;  %v1362_v2 = vcombine.low %v2163_v12, %v2165_v13  ;;  %v1363_v3 = vcombine.low %v2167_v14, %v2169_v15  ;;  %s2513_s29 = sld [smem:[#allocation25_spill]] (!%p1380_p1) }
  0x85   : > { %1439 = vmatprep.mubr.bf16.mxu0 %v1356_v50  ;;  %1424 = vmatpush3.bf16.msra.mxu0 %v1604_v49  ;;  %v1608_v56 = vld [vmem:[%s2124_s21 + $0x18] sm:$0xff]   ;;  %v1614_v57 = vld [vmem:[%s2171_s23 + $0x28] sm:$0xff]   ;;  %v1609_v58 = vld [vmem:[%s2124_s21 + $0x10] sm:$0xff]   ;;  %s2514_s6 = sld [smem:[#allocation26_spill]] (!%p1380_p1) }
  0x86   : > { %1425 = vmatprep.subr.bf16.mxu0 %v1605_v51  ;;  %1455 = vmatprep.subr.bf16.mxu1 %v1612_v54  ;;  %v1615_v59 = vld [vmem:[%s2171_s23 + $0x20] sm:$0xff]   ;;  %v1610_v60 = vld [vmem:[%s2124_s21 + $0x8] sm:$0xff]   ;;  %v1616_v61 = vld [vmem:[%s2171_s23 + $0x18] sm:$0xff]  }
  0x87   : > { %1456 = vmatpush3.bf16.msra.mxu1 %v1612_v54  ;;  %v1611_v62 = vld [vmem:[%s2124_s21] sm:$0xff]   ;;  %v1617_v4 = vld [vmem:[%s2171_s23 + $0x10] sm:$0xff]   ;;  %v1618_v5 = vld [vmem:[%s2171_s23 + $0x8] sm:$0xff]  }
  0x88   : > { %1457 = vmatprep.subr.bf16.mxu1 %v1613_v55  ;;  %v1619_v6 = vld [vmem:[%s2171_s23] sm:$0xff]  }
  0x89   : > { %1426 = vmatpush3.bf16.msra.mxu0 %v1605_v51  ;;  %v1355_v9 = vld [vmem:[%s399_s22] ss:$0 sm:$0xff] }
  0x8a   : > { %1427 = vmatprep.subr.bf16.mxu0 %v1606_v52 }
  0x8b   : > { %1458 = vmatpush3.bf16.msra.mxu1 %v1613_v55 }
  0x8c   : > { %1459 = vmatprep.subr.bf16.mxu1 %v1614_v57 }
  0x8d   : > { %1428 = vmatpush3.bf16.msra.mxu0 %v1606_v52 }
  0x8e   : > { %1429 = vmatprep.subr.bf16.mxu0 %v1607_v53 }
  0x8f   : > { %1460 = vmatpush3.bf16.msra.mxu1 %v1614_v57 }
  0x90   : > { %1461 = vmatprep.subr.bf16.mxu1 %v1615_v59 }
  0x91   : > { %1430 = vmatpush3.bf16.msra.mxu0 %v1607_v53 }
  0x92   : > { %1431 = vmatprep.subr.bf16.mxu0 %v1608_v56 }
  0x93   : > { %1462 = vmatpush3.bf16.msra.mxu1 %v1615_v59 }
  0x94   : > { %1463 = vmatprep.subr.bf16.mxu1 %v1616_v61 }
  0x95   : > { %1432 = vmatpush3.bf16.msra.mxu0 %v1608_v56 }
  0x96   : > { %1433 = vmatprep.subr.bf16.mxu0 %v1609_v58 }
  0x97   : > { %1464 = vmatpush3.bf16.msra.mxu1 %v1616_v61 }
  0x98   : > { %1465 = vmatprep.subr.bf16.mxu1 %v1617_v4 }
  0x99   : > { %1434 = vmatpush3.bf16.msra.mxu0 %v1609_v58 }
  0x9a   : > { %1435 = vmatprep.subr.bf16.mxu0 %v1610_v60 }
  0x9b   : > { %1466 = vmatpush3.bf16.msra.mxu1 %v1617_v4 }
  0x9c   : > { %1467 = vmatprep.subr.bf16.mxu1 %v1618_v5 }
  0x9d   : > { %1436 = vmatpush3.bf16.msra.mxu0 %v1610_v60 }
  0x9e   : > { %1437 = vmatprep.subr.bf16.mxu0 %v1611_v62 }
  0x9f   : > { %1468 = vmatpush3.bf16.msra.mxu1 %v1618_v5  ;;  %v713_v5 = vld [vmem:[#allocation2 + $0x18] sm:$0xff] }
  0xa0   : > { %1469 = vmatprep.subr.bf16.mxu1 %v1619_v6 }
  0xa1   : > { %1438 = vmatpush3.bf16.msra.mxu0 %v1611_v62 }
  0xa3   : > { %1470 = vmatpush3.bf16.msra.mxu1 %v1619_v6 }
  0xa4   : > { %1440 = vmatmul.mubr.bf16.vlgmr.msra.gmra.mxu0 %v1357_v63 }
  0xa5   : > { %1443 = vmatprep.mubr.bf16.mxu0 %v1358_v0 }
  0xac   : > { %1444 = vmatmul.mubr.bf16.gmra.mxu0 %v1359_v1 }
  0xad   : > { %1447 = vmatprep.mubr.bf16.mxu0 %v1360_v16  ;;  %v712_v16 = vld [vmem:[#allocation2 + $0x58] sm:$0xff] }
  0xb4   : > { %1448 = vmatmul.mubr.bf16.gmra.mxu0 %v1361_v17 }
  0xb5   : > { %1451 = vmatprep.mubr.bf16.mxu0 %v1362_v2  ;;  %v710_v2 = vld [vmem:[#allocation2 + $0x30] sm:$0xff] }
  0xbc   : > { %1452 = vmatmul.mubr.bf16.gmra.mxu0 %v1363_v3 }
 0x164   : > { %v1441_v7 = vpop.f32.mrf.mxu0 }
 0x165   : > { %v640_v13 = vadd.f32 %v1441_v7, %v1355_v9 }
 0x166   : > { %v631_v8 = vpop.f32.mrf.mxu0 }
 0x167   : > { %v632_v11 = vadd.f32 %v1355_v9, %v631_v8  ;;  %v696_v22 = vmax.f32 %v640_v13, 0.0  ;;  %v711_v8 = vld [vmem:[#allocation2] sm:$0xff] }
 0x168   : > { %v1442_v10 = vpop.f32.mrf.mxu0 }
 0x169   : > { %v643_v12 = vadd.f32 %v1442_v10, %v1355_v9  ;;  %v694_v20 = vmax.f32 %v632_v11, 0.0  ;;  %v716_v11 = vld [vmem:[#allocation2 + $0x8] sm:$0xff] }
 0x16a   : > { %v634_v14 = vpop.f32.mrf.mxu0 }
 0x16b   : > { %v635_v15 = vadd.f32 %v1355_v9, %v634_v14  ;;  %v697_v18 = vmax.f32 %v643_v12, 0.0  ;;  %v714_v14 = vld [vmem:[#allocation2 + $0x50] sm:$0xff] }
 0x16c   : > { %v1445_v19 = vpop.f32.mrf.mxu0 }
 0x16d   : > { %v695_v21 = vmax.f32 %v635_v15, 0.0  ;;  %v727_v25 = vpack.c.bf16 %v697_v18, %v696_v22  ;;  %v656_v29 = vadd.f32 %v1445_v19, %v1355_v9  ;;  %v717_v19 = vld [vmem:[#allocation2 + $0x48] sm:$0xff] }
 0x16e   : > { %v647_v23 = vpop.f32.mrf.mxu0  ;;  %v715_v22 = vld [vmem:[#allocation2 + $0x68] sm:$0xff] }
 0x16f   : > { %v726_v24 = vpack.c.bf16 %v695_v21, %v694_v20  ;;  %v648_v27 = vadd.f32 %v1355_v9, %v647_v23  ;;  %v700_v36 = vmax.f32 %v656_v29, 0.0 }
 0x170   : > { %v1446_v26 = vpop.f32.mrf.mxu0 }
 0x171   : > { %v659_v28 = vadd.f32 %v1446_v26, %v1355_v9  ;;  %1471 = vmatprep.mubr.bf16.mxu1 %v726_v24  ;;  %v698_v34 = vmax.f32 %v648_v27, 0.0 }
 0x172   : > { %v650_v30 = vpop.f32.mrf.mxu0  ;;  %1472 = vmatmul.mubr.bf16.vlgmr.msra.gmra.mxu1 %v727_v25  ;;  %v720_v25 = vld [vmem:[#allocation2 + $0x10] sm:$0xff] }
 0x173   : > { %v651_v31 = vadd.f32 %v1355_v9, %v650_v30  ;;  %v701_v32 = vmax.f32 %v659_v28, 0.0  ;;  %v718_v28 = vld [vmem:[#allocation2 + $0x40] sm:$0xff] }
 0x174   : > { %v1449_v33 = vpop.f32.mrf.mxu0 }
 0x175   : > { %v699_v35 = vmax.f32 %v651_v31, 0.0  ;;  %v729_v39 = vpack.c.bf16 %v701_v32, %v700_v36  ;;  %v672_v43 = vadd.f32 %v1449_v33, %v1355_v9  ;;  %v721_v31 = vld [vmem:[#allocation2 + $0x38] sm:$0xff] }
 0x176   : > { %v663_v37 = vpop.f32.mrf.mxu0 }
 0x177   : > { %v728_v38 = vpack.c.bf16 %v699_v35, %v698_v34  ;;  %v664_v41 = vadd.f32 %v1355_v9, %v663_v37  ;;  %v704_v50 = vmax.f32 %v672_v43, 0.0  ;;  %v719_v34 = vld [vmem:[#allocation2 + $0x20] sm:$0xff]  ;;  %v724_v37 = vld [vmem:[#allocation2 + $0x78] sm:$0xff]  ;;  %v725_v43 = vld [vmem:[#allocation2 + $0x28] sm:$0xff] }
 0x178   : > { %v1450_v40 = vpop.f32.mrf.mxu0 }
 0x179   : > { %v675_v42 = vadd.f32 %v1450_v40, %v1355_v9  ;;  %1475 = vmatprep.mubr.bf16.mxu1 %v728_v38  ;;  %v702_v48 = vmax.f32 %v664_v41, 0.0  ;;  %v722_v40 = vld [vmem:[#allocation2 + $0x60] sm:$0xff] }
 0x17a   : > { %v666_v44 = vpop.f32.mrf.mxu0  ;;  %1476 = vmatmul.mubr.bf16.gmra.mxu1 %v729_v39 }
 0x17b   : > { %v667_v45 = vadd.f32 %v1355_v9, %v666_v44  ;;  %v705_v46 = vmax.f32 %v675_v42, 0.0 }
 0x17c   : > { %v1453_v47 = vpop.f32.mrf.mxu0 }
 0x17d   : > { %v703_v49 = vmax.f32 %v667_v45, 0.0  ;;  %v731_v53 = vpack.c.bf16 %v705_v46, %v704_v50  ;;  %v688_v57 = vadd.f32 %v1453_v47, %v1355_v9  ;;  %v723_v46 = vld [vmem:[#allocation2 + $0x70] sm:$0xff] }
 0x17e   : > { %v679_v51 = vpop.f32.mrf.mxu0 }
 0x17f   : > { %v730_v52 = vpack.c.bf16 %v703_v49, %v702_v48  ;;  %v680_v55 = vadd.f32 %v1355_v9, %v679_v51  ;;  %v708_v63 = vmax.f32 %v688_v57, 0.0 }
 0x180   : > { %v1454_v54 = vpop.f32.mrf.mxu0 }
 0x181   : > { %v691_v56 = vadd.f32 %v1454_v54, %v1355_v9  ;;  %1479 = vmatprep.mubr.bf16.mxu1 %v730_v52  ;;  %v706_v61 = vmax.f32 %v680_v55, 0.0 }
 0x182   : > { %v682_v58 = vpop.f32.mrf.mxu0  ;;  %1480 = vmatmul.mubr.bf16.gmra.mxu1 %v731_v53 }
 0x183   : > { %v683_v59 = vadd.f32 %v1355_v9, %v682_v58  ;;  %v709_v60 = vmax.f32 %v691_v56, 0.0 }
 0x185   : > { %v707_v62 = vmax.f32 %v683_v59, 0.0  ;;  %v733_v1 = vpack.c.bf16 %v709_v60, %v708_v63 }
 0x187   : > { %v732_v0 = vpack.c.bf16 %v707_v62, %v706_v61 }
 0x189   : > { %1483 = vmatprep.mubr.bf16.mxu1 %v732_v0 }
 0x18a   : > { %1484 = vmatmul.mubr.bf16.gmra.mxu1 %v733_v1 }
 0x232   : > { %v1473_v17 = vpop.f32.mrf.mxu1 }
 0x233   : > { %v897_v3 = vadd.f32 %v1473_v17, %v712_v16 }
 0x234   : > { %v832_v4 = vpop.f32.mrf.mxu1 }
 0x235   : > { %913 = vst [vmem:[#allocation2 + $0x58] sm:$0xff] %v897_v3  ;;  %v895_v6 = vadd.f32 %v832_v4, %v710_v2 }
 0x236   : > { %v1474_v7 = vpop.f32.mrf.mxu1 }
 0x237   : > { %911 = vst [vmem:[#allocation2 + $0x30] sm:$0xff] %v895_v6  ;;  %v898_v9 = vadd.f32 %v1474_v7, %v713_v5 }
 0x238   : > { %v835_v10 = vpop.f32.mrf.mxu1 }
 0x239   : > { %914 = vst [vmem:[#allocation2 + $0x18] sm:$0xff] %v898_v9  ;;  %v896_v12 = vadd.f32 %v835_v10, %v711_v8 }
 0x23a   : > { %v1477_v13 = vpop.f32.mrf.mxu1 }
 0x23b   : > { %912 = vst [vmem:[#allocation2] sm:$0xff] %v896_v12  ;;  %v901_v15 = vadd.f32 %v1477_v13, %v716_v11 }
 0x23c   : > { %v848_v18 = vpop.f32.mrf.mxu1 }
 0x23d   : > { %917 = vst [vmem:[#allocation2 + $0x8] sm:$0xff] %v901_v15  ;;  %v899_v20 = vadd.f32 %v848_v18, %v714_v14 }
 0x23e   : > { %v1478_v21 = vpop.f32.mrf.mxu1 }
 0x23f   : > { %915 = vst [vmem:[#allocation2 + $0x50] sm:$0xff] %v899_v20  ;;  %v902_v23 = vadd.f32 %v1478_v21, %v717_v19 }
 0x240   : > { %v851_v24 = vpop.f32.mrf.mxu1 }
 0x241   : > { %918 = vst [vmem:[#allocation2 + $0x48] sm:$0xff] %v902_v23  ;;  %v900_v26 = vadd.f32 %v851_v24, %v715_v22 }
 0x242   : > { %v1481_v27 = vpop.f32.mrf.mxu1 }
 0x243   : > { %916 = vst [vmem:[#allocation2 + $0x68] sm:$0xff] %v900_v26  ;;  %v905_v29 = vadd.f32 %v1481_v27, %v720_v25 }
 0x244   : > { %v864_v30 = vpop.f32.mrf.mxu1 }
 0x245   : > { %921 = vst [vmem:[#allocation2 + $0x10] sm:$0xff] %v905_v29  ;;  %v903_v32 = vadd.f32 %v864_v30, %v718_v28 }
 0x246   : > { %v1482_v33 = vpop.f32.mrf.mxu1 }
 0x247   : > { %919 = vst [vmem:[#allocation2 + $0x40] sm:$0xff] %v903_v32  ;;  %v906_v35 = vadd.f32 %v1482_v33, %v721_v31 }
 0x248   : > { %v867_v36 = vpop.f32.mrf.mxu1 }
 0x249   : > { %922 = vst [vmem:[#allocation2 + $0x38] sm:$0xff] %v906_v35  ;;  %v904_v38 = vadd.f32 %v867_v36, %v719_v34 }
 0x24a   : > { %v1485_v39 = vpop.f32.mrf.mxu1 }
 0x24b   : > { %920 = vst [vmem:[#allocation2 + $0x20] sm:$0xff] %v904_v38  ;;  %v909_v41 = vadd.f32 %v1485_v39, %v724_v37 }
 0x24c   : > { %v880_v42 = vpop.f32.mrf.mxu1 }
 0x24d   : > { %925 = vst [vmem:[#allocation2 + $0x78] sm:$0xff] %v909_v41  ;;  %v907_v44 = vadd.f32 %v880_v42, %v722_v40 }
 0x24e   : > { %v1486_v45 = vpop.f32.mrf.mxu1 }
 0x24f   : > { %923 = vst [vmem:[#allocation2 + $0x60] sm:$0xff] %v907_v44  ;;  %v910_v47 = vadd.f32 %v1486_v45, %v725_v43  ;;  %930 = sbr.rel (%p1380_p1) target bundleno = 936 (0x3a8), region = 68 }
 0x250   : > { %v883_v48 = vpop.f32.mrf.mxu1 }
 0x251   : > { %926 = vst [vmem:[#allocation2 + $0x28] sm:$0xff] %v910_v47  ;;  %v908_v49 = vadd.f32 %v883_v48, %v723_v46 }
 0x253   : > { %924 = vst [vmem:[#allocation2 + $0x70] sm:$0xff] %v908_v49 }
 0x254   : > { %v931_v50 = vld [vmem:[#allocation2 + $0x30] sm:$0xff]  ;;  %v933_v51 = vld [vmem:[#allocation2 + $0x58] sm:$0xff]  ;;  %v932_v52 = vld [vmem:[#allocation2] sm:$0xff] }
 0x255   : > { %947 = vadd.xlane.f32.xlu0 %v931_v50  ;;  %951 = vadd.xlane.f32.xlu1 %v933_v51  ;;  %v934_v53 = vld [vmem:[#allocation2 + $0x18] sm:$0xff]  ;;  %v935_v54 = vld [vmem:[#allocation2 + $0x50] sm:$0xff]  ;;  %v936_v55 = vld [vmem:[#allocation2 + $0x68] sm:$0xff] }
 0x256   : > { %v937_v56 = vld [vmem:[#allocation2 + $0x8] sm:$0xff]  ;;  %v939_v58 = vld [vmem:[#allocation2 + $0x40] sm:$0xff]  ;;  %v941_v60 = vld [vmem:[#allocation2 + $0x10] sm:$0xff] }
 0x257   : > { %v938_v57 = vld [vmem:[#allocation2 + $0x48] sm:$0xff]  ;;  %v940_v59 = vld [vmem:[#allocation2 + $0x20] sm:$0xff]  ;;  %v2233_v61 = vld [vmem:[#allocation2 + $0x38] sm:$0xff] }
 0x258   : > { %v2236_v62 = vld [vmem:[#allocation2 + $0x60] sm:$0xff]  ;;  %v2242_v0 = vld [vmem:[#allocation2 + $0x78] sm:$0xff]  ;;  %v2244_v1 = vld [vmem:[#allocation2 + $0x28] sm:$0xff] }
 0x259   : > { %949 = vadd.xlane.f32.xlu0 %v932_v52  ;;  %953 = vadd.xlane.f32.xlu1 %v934_v53 }
 0x25a   : > { %v2238_v63 = vld [vmem:[#allocation2 + $0x70] sm:$0xff] }
 0x25d   : > { %955 = vadd.xlane.f32.xlu0 %v935_v54  ;;  %957 = vadd.xlane.f32.xlu1 %v936_v55 }
 0x261   : > { %959 = vadd.xlane.f32.xlu0 %v937_v56  ;;  %961 = vadd.xlane.f32.xlu1 %v938_v57 }
 0x265   : > { %963 = vadd.xlane.f32.xlu0 %v939_v58  ;;  %965 = vadd.xlane.f32.xlu1 %v940_v59 }
 0x269   : > { %967 = vadd.xlane.f32.xlu0 %v941_v60  ;;  %969 = vadd.xlane.f32.xlu1 %v2233_v61 }
 0x26d   : > { %971 = vadd.xlane.f32.xlu0 %v2236_v62  ;;  %973 = vadd.xlane.f32.xlu1 %v2238_v63 }
 0x271   : > { %975 = vadd.xlane.f32.xlu0 %v2242_v0  ;;  %977 = vadd.xlane.f32.xlu1 %v2244_v1 }
 0x2de   : > { %v948_v16 = vpop.xlane.xlu0 %947  ;;  %v952_v17 = vpop.xlane.xlu1 %951 }
 0x2df   : > { %v980_v2 = vmul.f32 0.0078125, %v948_v16  ;;  %v982_v3 = vmul.f32 0.0078125, %v952_v17 }
 0x2e1   : > { %v2248_v4 = vsub.f32 %v931_v50, %v980_v2  ;;  %v2250_v5 = vsub.f32 %v933_v51, %v982_v3 }
 0x2e2   : > { %v950_v6 = vpop.xlane.xlu0 %949  ;;  %v954_v7 = vpop.xlane.xlu1 %953 }
 0x2e3   : > { %v981_v8 = vmul.f32 0.0078125, %v950_v6  ;;  %v1012_v9 = vmul.f32 %v2248_v4, %v2248_v4  ;;  %v983_v10 = vmul.f32 0.0078125, %v954_v7  ;;  %v1014_v13 = vmul.f32 %v2250_v5, %v2250_v5 }
 0x2e5   : > { %v2254_v11 = vsub.f32 %v932_v52, %v981_v8  ;;  %1028 = vadd.xlane.f32.xlu0 %v1012_v9  ;;  %v2256_v12 = vsub.f32 %v934_v53, %v983_v10 }
 0x2e6   : > { %v956_v14 = vpop.xlane.xlu0 %955  ;;  %v958_v15 = vpop.xlane.xlu1 %957 }
 0x2e7   : > { %v984_v18 = vmul.f32 0.0078125, %v956_v14  ;;  %v1013_v19 = vmul.f32 %v2254_v11, %v2254_v11  ;;  %v985_v20 = vmul.f32 0.0078125, %v958_v15  ;;  %v1015_v23 = vmul.f32 %v2256_v12, %v2256_v12 }
 0x2e9   : > { %v2262_v21 = vsub.f32 %v935_v54, %v984_v18  ;;  %1032 = vadd.xlane.f32.xlu0 %v1014_v13  ;;  %1030 = vadd.xlane.f32.xlu1 %v1013_v19  ;;  %v2264_v22 = vsub.f32 %v936_v55, %v985_v20 }
 0x2ea   : > { %v960_v24 = vpop.xlane.xlu0 %959  ;;  %v962_v25 = vpop.xlane.xlu1 %961 }
 0x2eb   : > { %v986_v26 = vmul.f32 0.0078125, %v960_v24  ;;  %v1016_v27 = vmul.f32 %v2262_v21, %v2262_v21  ;;  %v987_v28 = vmul.f32 0.0078125, %v962_v25  ;;  %v1017_v31 = vmul.f32 %v2264_v22, %v2264_v22 }
 0x2ed   : > { %v2270_v29 = vsub.f32 %v937_v56, %v986_v26  ;;  %1034 = vadd.xlane.f32.xlu1 %v1015_v23  ;;  %1036 = vadd.xlane.f32.xlu0 %v1016_v27  ;;  %v2272_v30 = vsub.f32 %v938_v57, %v987_v28 }
 0x2ee   : > { %v964_v32 = vpop.xlane.xlu0 %963  ;;  %v966_v33 = vpop.xlane.xlu1 %965 }
 0x2ef   : > { %v988_v34 = vmul.f32 0.0078125, %v964_v32  ;;  %v1018_v35 = vmul.f32 %v2270_v29, %v2270_v29  ;;  %v989_v36 = vmul.f32 0.0078125, %v966_v33  ;;  %v1019_v39 = vmul.f32 %v2272_v30, %v2272_v30 }
 0x2f1   : > { %v2278_v37 = vsub.f32 %v939_v58, %v988_v34  ;;  %1038 = vadd.xlane.f32.xlu1 %v1017_v31  ;;  %1040 = vadd.xlane.f32.xlu0 %v1018_v35  ;;  %v2280_v38 = vsub.f32 %v940_v59, %v989_v36  ;;  %v2320_v36 = vld [vmem:[%s2513_s29] ss:$0 sm:$0xff] }
 0x2f2   : > { %v968_v40 = vpop.xlane.xlu0 %967  ;;  %v970_v41 = vpop.xlane.xlu1 %969 }
 0x2f3   : > { %v990_v42 = vmul.f32 0.0078125, %v968_v40  ;;  %v1020_v43 = vmul.f32 %v2278_v37, %v2278_v37  ;;  %v991_v44 = vmul.f32 0.0078125, %v970_v41  ;;  %v1021_v47 = vmul.f32 %v2280_v38, %v2280_v38 }
 0x2f5   : > { %v2286_v45 = vsub.f32 %v941_v60, %v990_v42  ;;  %1042 = vadd.xlane.f32.xlu1 %v1019_v39  ;;  %1044 = vadd.xlane.f32.xlu0 %v1020_v43  ;;  %v2289_v46 = vsub.f32 %v2233_v61, %v991_v44  ;;  %v2326_v42 = vld [vmem:[%s2514_s6] ss:$0 sm:$0xff] }
 0x2f6   : > { %v972_v48 = vpop.xlane.xlu0 %971  ;;  %v974_v49 = vpop.xlane.xlu1 %973 }
 0x2f7   : > { %v992_v50 = vmul.f32 0.0078125, %v972_v48  ;;  %v1022_v51 = vmul.f32 %v2286_v45, %v2286_v45  ;;  %v993_v52 = vmul.f32 0.0078125, %v974_v49  ;;  %v1023_v55 = vmul.f32 %v2289_v46, %v2289_v46 }
 0x2f9   : > { %v2296_v53 = vsub.f32 %v2236_v62, %v992_v50  ;;  %1046 = vadd.xlane.f32.xlu1 %v1021_v47  ;;  %1048 = vadd.xlane.f32.xlu0 %v1022_v51  ;;  %v2299_v54 = vsub.f32 %v2238_v63, %v993_v52 }
 0x2fa   : > { %v976_v56 = vpop.xlane.xlu0 %975  ;;  %v978_v57 = vpop.xlane.xlu1 %977 }
 0x2fb   : > { %v994_v58 = vmul.f32 0.0078125, %v976_v56  ;;  %v1024_v59 = vmul.f32 %v2296_v53, %v2296_v53  ;;  %v995_v60 = vmul.f32 0.0078125, %v978_v57  ;;  %v1025_v63 = vmul.f32 %v2299_v54, %v2299_v54 }
 0x2fd   : > { %v2306_v61 = vsub.f32 %v2242_v0, %v994_v58  ;;  %1050 = vadd.xlane.f32.xlu1 %v1023_v55  ;;  %1052 = vadd.xlane.f32.xlu0 %v1024_v59  ;;  %v2309_v62 = vsub.f32 %v2244_v1, %v995_v60 }
 0x2ff   : > { %v1026_v16 = vmul.f32 %v2306_v61, %v2306_v61  ;;  %v1027_v17 = vmul.f32 %v2309_v62, %v2309_v62 }
 0x301   : > { %1054 = vadd.xlane.f32.xlu1 %v1025_v63  ;;  %1056 = vadd.xlane.f32.xlu0 %v1026_v16 }
 0x305   : > { %1058 = vadd.xlane.f32.xlu1 %v1027_v17 }
 0x36e   : > { %v1029_v2 = vpop.xlane.xlu0 %1028 }
 0x36f   : > { %v1060_v0 = vmul.f32 0.0078125, %v1029_v2 }
 0x371   : > { %v1076_v3 = vadd.f32 1e-05, %v1060_v0 }
 0x372   : > { %v1031_v6 = vpop.xlane.xlu1 %1030  ;;  %v1033_v7 = vpop.xlane.xlu0 %1032 }
 0x373   : > { %1620 = vrsqrt.f32 %v1076_v3  ;;  %v1061_v1 = vmul.f32 0.0078125, %v1031_v6  ;;  %v1062_v8 = vmul.f32 0.0078125, %v1033_v7 }
 0x375   : > { %v1077_v9 = vadd.f32 1e-05, %v1061_v1  ;;  %v1078_v10 = vadd.f32 1e-05, %v1062_v8 }
 0x376   : > { %v1035_v13 = vpop.xlane.xlu1 %1034  ;;  %v1037_v14 = vpop.xlane.xlu0 %1036 }
 0x377   : > { %1622 = vrsqrt.f32 %v1077_v9  ;;  %v1063_v15 = vmul.f32 0.0078125, %v1035_v13  ;;  %v1064_v18 = vmul.f32 0.0078125, %v1037_v14 }
 0x378   : > { %1624 = vrsqrt.f32 %v1078_v10 }
 0x379   : > { %v1079_v19 = vadd.f32 1e-05, %v1063_v15  ;;  %v1080_v20 = vadd.f32 1e-05, %v1064_v18 }
 0x37a   : > { %v1039_v23 = vpop.xlane.xlu1 %1038  ;;  %v1041_v24 = vpop.xlane.xlu0 %1040 }
 0x37b   : > { %1626 = vrsqrt.f32 %v1079_v19  ;;  %v1065_v25 = vmul.f32 0.0078125, %v1039_v23  ;;  %v1066_v26 = vmul.f32 0.0078125, %v1041_v24 }
 0x37c   : > { %1628 = vrsqrt.f32 %v1080_v20 }
 0x37d   : > { %v1081_v27 = vadd.f32 1e-05, %v1065_v25  ;;  %v1082_v28 = vadd.f32 1e-05, %v1066_v26 }
 0x37e   : > { %v1043_v31 = vpop.xlane.xlu1 %1042  ;;  %v1045_v32 = vpop.xlane.xlu0 %1044 }
 0x37f   : > { %1630 = vrsqrt.f32 %v1081_v27  ;;  %v1067_v33 = vmul.f32 0.0078125, %v1043_v31  ;;  %v1068_v34 = vmul.f32 0.0078125, %v1045_v32 }
 0x380   : > { %v1621_v35 = vpop.eup %1620  ;;  %1632 = vrsqrt.f32 %v1082_v28 }
 0x381   : > { %v1108_v39 = vmul.f32 %v1621_v35, %v2248_v4  ;;  %v1083_v40 = vadd.f32 1e-05, %v1067_v33  ;;  %v1084_v41 = vadd.f32 1e-05, %v1068_v34 }
 0x382   : > { %v1047_v43 = vpop.xlane.xlu1 %1046  ;;  %v1049_v44 = vpop.xlane.xlu0 %1048 }
 0x383   : > { %v1131_v47 = vmul.f32 %v2320_v36, %v1108_v39  ;;  %1634 = vrsqrt.f32 %v1083_v40  ;;  %v1069_v48 = vmul.f32 0.0078125, %v1047_v43  ;;  %v1070_v49 = vmul.f32 0.0078125, %v1049_v44 }
 0x384   : > { %v1623_v50 = vpop.eup %1622  ;;  %1636 = vrsqrt.f32 %v1084_v41 }
 0x385   : > { %v1625_v51 = vpop.eup %1624  ;;  %v1154_v4 = vadd.f32 %v2326_v42, %v1131_v47  ;;  %v1109_v52 = vmul.f32 %v1623_v50, %v2254_v11  ;;  %v1085_v55 = vadd.f32 1e-05, %v1069_v48  ;;  %v1086_v56 = vadd.f32 1e-05, %v1070_v49 }
 0x386   : > { %v1110_v57 = vmul.f32 %v1625_v51, %v2250_v5  ;;  %v1051_v58 = vpop.xlane.xlu1 %1050  ;;  %v1053_v59 = vpop.xlane.xlu0 %1052 }
 0x387   : > { %1170 = vst [vmem:[%s2173_s24] sm:$0xff] %v1154_v4  ;;  %v1132_v60 = vmul.f32 %v2320_v36, %v1109_v52  ;;  %1638 = vrsqrt.f32 %v1085_v55  ;;  %v1071_v63 = vmul.f32 0.0078125, %v1051_v58  ;;  %v1072_v16 = vmul.f32 0.0078125, %v1053_v59 }
 0x388   : > { %v1627_v17 = vpop.eup %1626  ;;  %v1133_v2 = vmul.f32 %v2320_v36, %v1110_v57  ;;  %1640 = vrsqrt.f32 %v1086_v56 }
 0x389   : > { %v1629_v0 = vpop.eup %1628  ;;  %v1155_v11 = vadd.f32 %v2326_v42, %v1132_v60  ;;  %v1111_v3 = vmul.f32 %v1627_v17, %v2256_v12  ;;  %v1087_v5 = vadd.f32 1e-05, %v1071_v63  ;;  %v1088_v6 = vadd.f32 1e-05, %v1072_v16 }
 0x38a   : > { %v1156_v7 = vadd.f32 %v2326_v42, %v1133_v2  ;;  %v1112_v1 = vmul.f32 %v1629_v0, %v2262_v21  ;;  %v1055_v8 = vpop.xlane.xlu1 %1054  ;;  %v1057_v9 = vpop.xlane.xlu0 %1056 }
 0x38b   : > { %1171 = vst [vmem:[%s2173_s24 + $0x8] sm:$0xff] %v1155_v11  ;;  %v1134_v10 = vmul.f32 %v2320_v36, %v1111_v3  ;;  %1642 = vrsqrt.f32 %v1087_v5  ;;  %v1073_v13 = vmul.f32 0.0078125, %v1055_v8  ;;  %v1074_v14 = vmul.f32 0.0078125, %v1057_v9 }
 0x38c   : > { %v1631_v15 = vpop.eup %1630  ;;  %1172 = vst [vmem:[%s2173_s24 + $0x10] sm:$0xff] %v1156_v7  ;;  %v1135_v12 = vmul.f32 %v2320_v36, %v1112_v1  ;;  %1644 = vrsqrt.f32 %v1088_v6 }
 0x38d   : > { %v1633_v18 = vpop.eup %1632  ;;  %v1157_v19 = vadd.f32 %v2326_v42, %v1134_v10  ;;  %v1113_v21 = vmul.f32 %v1631_v15, %v2264_v22  ;;  %v1089_v20 = vadd.f32 1e-05, %v1073_v13  ;;  %v1090_v23 = vadd.f32 1e-05, %v1074_v14 }
 0x38e   : > { %v1158_v24 = vadd.f32 %v2326_v42, %v1135_v12  ;;  %v1114_v25 = vmul.f32 %v1633_v18, %v2270_v29  ;;  %v1059_v26 = vpop.xlane.xlu1 %1058 }
 0x38f   : > { %1173 = vst [vmem:[%s2173_s24 + $0x18] sm:$0xff] %v1157_v19  ;;  %v1136_v27 = vmul.f32 %v2320_v36, %v1113_v21  ;;  %1646 = vrsqrt.f32 %v1089_v20  ;;  %v1075_v28 = vmul.f32 0.0078125, %v1059_v26 }
 0x390   : > { %v1635_v31 = vpop.eup %1634  ;;  %1174 = vst [vmem:[%s2173_s24 + $0x20] sm:$0xff] %v1158_v24  ;;  %v1137_v32 = vmul.f32 %v2320_v36, %v1114_v25  ;;  %1648 = vrsqrt.f32 %v1090_v23 }
 0x391   : > { %v1637_v22 = vpop.eup %1636  ;;  %v1159_v33 = vadd.f32 %v2326_v42, %v1136_v27  ;;  %v1115_v34 = vmul.f32 %v1635_v31, %v2272_v30  ;;  %v1091_v29 = vadd.f32 1e-05, %v1075_v28 }
 0x392   : > { %v1160_v35 = vadd.f32 %v2326_v42, %v1137_v32  ;;  %v1116_v39 = vmul.f32 %v1637_v22, %v2278_v37 }
 0x393   : > { %1175 = vst [vmem:[%s2173_s24 + $0x28] sm:$0xff] %v1159_v33  ;;  %v1138_v40 = vmul.f32 %v2320_v36, %v1115_v34  ;;  %1650 = vrsqrt.f32 %v1091_v29 }
 0x394   : > { %v1639_v41 = vpop.eup %1638  ;;  %1176 = vst [vmem:[%s2173_s24 + $0x30] sm:$0xff] %v1160_v35  ;;  %v1139_v43 = vmul.f32 %v2320_v36, %v1116_v39 }
 0x395   : > { %v1641_v44 = vpop.eup %1640  ;;  %v1161_v47 = vadd.f32 %v2326_v42, %v1138_v40  ;;  %v1117_v30 = vmul.f32 %v1639_v41, %v2280_v38 }
 0x396   : > { %v1162_v48 = vadd.f32 %v2326_v42, %v1139_v43  ;;  %v1118_v49 = vmul.f32 %v1641_v44, %v2286_v45 }
 0x397   : > { %1177 = vst [vmem:[%s2173_s24 + $0x38] sm:$0xff] %v1161_v47  ;;  %v1140_v37 = vmul.f32 %v2320_v36, %v1117_v30 }
 0x398   : > { %v1643_v50 = vpop.eup %1642  ;;  %1178 = vst [vmem:[%s2173_s24 + $0x40] sm:$0xff] %v1162_v48  ;;  %v1141_v51 = vmul.f32 %v2320_v36, %v1118_v49 }
 0x399   : > { %v1645_v4 = vpop.eup %1644  ;;  %v1163_v52 = vadd.f32 %v2326_v42, %v1140_v37  ;;  %v1119_v55 = vmul.f32 %v1643_v50, %v2289_v46 }
 0x39a   : > { %v1164_v38 = vadd.f32 %v2326_v42, %v1141_v51  ;;  %v1120_v56 = vmul.f32 %v1645_v4, %v2296_v53 }
 0x39b   : > { %1179 = vst [vmem:[%s2173_s24 + $0x48] sm:$0xff] %v1163_v52  ;;  %v1142_v45 = vmul.f32 %v2320_v36, %v1119_v55 }
 0x39c   : > { %v1647_v57 = vpop.eup %1646  ;;  %1180 = vst [vmem:[%s2173_s24 + $0x50] sm:$0xff] %v1164_v38  ;;  %v1143_v58 = vmul.f32 %v2320_v36, %v1120_v56 }
 0x39d   : > { %v1649_v59 = vpop.eup %1648  ;;  %v1165_v60 = vadd.f32 %v2326_v42, %v1142_v45  ;;  %v1121_v46 = vmul.f32 %v1647_v57, %v2299_v54 }
 0x39e   : > { %v1166_v63 = vadd.f32 %v2326_v42, %v1143_v58  ;;  %v1122_v16 = vmul.f32 %v1649_v59, %v2306_v61 }
 0x39f   : > { %1181 = vst [vmem:[%s2173_s24 + $0x58] sm:$0xff] %v1165_v60  ;;  %v1144_v53 = vmul.f32 %v2320_v36, %v1121_v46 }
 0x3a0   : > { %v1651_v17 = vpop.eup %1650  ;;  %1182 = vst [vmem:[%s2173_s24 + $0x60] sm:$0xff] %v1166_v63  ;;  %v1145_v2 = vmul.f32 %v2320_v36, %v1122_v16 }
 0x3a1   : > { %v1167_v0 = vadd.f32 %v2326_v42, %v1144_v53  ;;  %v1123_v11 = vmul.f32 %v1651_v17, %v2309_v62 }
 0x3a2   : > { %v1168_v3 = vadd.f32 %v2326_v42, %v1145_v2 }
 0x3a3   : > { %1183 = vst [vmem:[%s2173_s24 + $0x68] sm:$0xff] %v1167_v0  ;;  %v1146_v54 = vmul.f32 %v2320_v36, %v1123_v11 }
 0x3a4   : > { %1184 = vst [vmem:[%s2173_s24 + $0x70] sm:$0xff] %v1168_v3 }
 0x3a5   : > { %v1169_v5 = vadd.f32 %v2326_v42, %v1146_v54 }
 0x3a7   : > { %1185 = vst [vmem:[%s2173_s24 + $0x78] sm:$0xff] %v1169_v5 }
 0x3a8 PF: > { %s2515_s14 = sld [smem:[#allocation15_spill]]  ;;  %s1200_s7 = sshll.u32 %s2173_s24, 4  ;;  %s2398_s7 = int_to_ptr.vmem [resolvable:$true] %s1200_s7 }
 0x3a9   : > { %s2517_s13 = sld [smem:[#allocation27_spill]]  ;;  %s1187_s22 = scalar_lea.sflag [#allocation5], %s2114_s0 }
 0x3aa   : > { %s1736_s23 = scalar_lea.vmem %s2398_s7, 2048  ;;  %s1868_s18 = smov [#allocation9]  }
 0x3ab   : > { %p1737_p10 = scmp.ne.s32.totalorder %s2398_s7, %s1736_s23  ;;  %s1740_s17 = sshll.u32 %s1868_s18, 4  ;;  %s1741_s17 = int_to_ptr.vmem [resolvable:$false] %s1740_s17 }
 0x3ac   : > { %s1742_s4 = scalar_lea.vmem %s1741_s17, 4096  ;;  %p1743_p8 = scmp.lt.s32.totalorder %s2398_s7, %s1741_s17 }
 0x3ad   : > { %p1738_p3 = pnand %p1737_p10, %p2063_p0  ;;  %p1744_p9 = scmp.lt.s32.totalorder %s1742_s4, %s1736_s23 }
 0x3ae   : > { %s1390_s1 = sshll.u32 %s2515_s14, 11 }
 0x3af   : > { %s2395_s8 = scalar_lea.hbm %s2517_s13, %s1390_s1  ;;  %p1739_p5 = pneg %p1738_p3 }
 0x3b0   : > { %p1745_p13 = por %p1744_p9, %p1743_p8 }
 0x3b2   : > { %p1746_p2 = pnand %p1745_p13, %p1739_p5 }
 0x3b4   : > { %1749 = shalt.err (!%p1746_p2)
}
 0x3b5   : > { %s1750_s24 = scalar_lea.hbm %s2395_s8, 2048  ;;  %s1754_s30 = scalar_lea.hbm %s2517_s13, 8192 }
 0x3b6   : > { %p1751_p12 = scmp.ne.s32.totalorder %s2395_s8, %s1750_s24  ;;  %p1755_p7 = scmp.lt.s32.totalorder %s2395_s8, %s2517_s13 }
 0x3b7   : > { %p1756_p11 = scmp.lt.s32.totalorder %s1754_s30, %s1750_s24 }
 0x3b8   : > { %p1752_p6 = pnand %p1751_p12, %p2063_p0 }
 0x3b9   : > { %p1757_p1 = por %p1756_p11, %p1755_p7 }
 0x3ba   : > { %p1753_p4 = pneg %p1752_p6 }
 0x3bc   : > { %p1758_p10 = pnand %p1757_p1, %p1753_p4 }
 0x3be   : > { %1761 = shalt.err (!%p1758_p10)
}
 0x3bf   : > { %s1869_s19 = smov 128   ;;  %s1870_s20 = smov 8  }
 0x3c0   : > { %1493 = dma.vmem_to_hbm [thread:$0]  (%p2063_p0), %s2398_s7, 2048, %s2395_s8, %s1187_s22, %s1869_s19, %s1869_s19, %s1870_s20  }
 0x3c1 PF: > { %p1510_p3 = scmp.ge.s32.totalorder %s1860_s11, 2  ;;  %s1215_s6 = sand.u32 1, %s1832_s27  }
 0x3c2   : > { %p2518_p5 = scmp.ne.s32.totalorder %s2505_s26, 0  ;;  %s1216_s14 = scalar_lea.sflag [#allocation5], %s1215_s6 }
 0x3c4   : > { %p1506_p8 = pnand %p1510_p3, %p2518_p5 }
 0x3c6   : > { %p1507_p9 = pneg %p1506_p8 }
 0x3c8   : > { %1815 = dma.done.wait (%p1507_p9), %s1216_s14, 2048  }
 0x3c9   : > { %1817 = vsyncadd (%p1507_p9), %s1216_s14, 4294965248  ;;  %s26_s11 = sadd.s32 1, %s1860_s11   ;;  %s2519_s1 = sld [smem:[#allocation13_spill]] }
 0x3ca   : > { %p23_p13 = scmp.ge.s32.totalorder %s26_s11, 10   ;;  %s2520_s26 = sld [smem:[#allocation18_spill]] }
 0x3cb   : > { %s2521_s0 = sld [smem:[#allocation14_spill]]  ;;  %s2526_s24 = smov %s1824_s25 }
 0x3cc   : > { %s2522_s29 = sld [smem:[#allocation21_spill]]  ;;  %s2528_s27 = smov %s1836_s28 }
 0x3cd   : > { %s2523_s8 = sld [smem:[#allocation16_spill]]  ;;  %s2530_s30 = smov %s1852_s9 }
 0x3ce   : > { %s2524_s15 = sld [smem:[#allocation17_spill]] }
 0x3cf   : > { %s2525_s10 = sld [smem:[#allocation19_spill]]  ;;  %s2527_s25 = smov %s2519_s1 }
 0x3d0   :  { %25 = sbr.rel (!%p23_p13) target bundleno = 18 (0x12), region = 128 }
 0x3d1   : > { %s2529_s28 = smov %s2521_s0 }
 0x3d4   : > { %s2531_s9 = smov %s2524_s15 }
 0x3d5   :  { %1221 = vsyncpa [#allocation4], 1 }
 0x3d6   :  { %1223 = vsyncpa [#allocation4 + $0x1], 1 }
 0x3d7   :  { %1224 = vsyncpa [#allocation7], 1 }
 0x3d8   :  { %1226 = vsyncpa [#allocation7 + $0x1], 1 }
 0x3d9   :  { %1227 = vsyncpa [#allocation5], 1 }
 0x3da   :  { %1229 = vsyncpa [#allocation5 + $0x1], 1 }

</bundles_post_ra>
